<compile_context>
chip_gen: v6e
topology: v6e:2x2x1
jax: 0.10.0
libtpu: 0.0.40
codegen_flags: <defaults>
</compile_context>

<pallas_src>
import jax
import jax.numpy as jnp
from jax.experimental import pallas as pl
from jax.experimental.pallas import tpu as pltpu


# ----------------------------------------------------------------------------
# Kernel factories.
# ----------------------------------------------------------------------------
def _make_conv3x3_stats_kernel(H, W, C_in, C_out, mm_dtype, pre_affine):
    """One image per grid step: optional (BN-affine + ReLU), 3x3 conv (pad=1,
    stride=1) as nine K=C_in tap matmuls, plus per-channel (sum, sumsq)
    partials accumulated across the grid into a resident stats block."""
    HW = H * W
    w_pow2 = (W & (W - 1)) == 0

    def kernel(*refs):
        if pre_affine:
            x_ref, w_ref, aff_ref, y_ref, stats_ref = refs
        else:
            x_ref, w_ref, y_ref, stats_ref = refs
            aff_ref = None

        n = pl.program_id(0)

        @pl.when(n == 0)
        def _():
            stats_ref[...] = jnp.zeros_like(stats_ref)

        src = x_ref[0].astype(jnp.float32)                  # (C_in, HW)
        if pre_affine:
            # Training-mode BN folded to per-channel scale/shift, then ReLU.
            src = jnp.maximum(src * aff_ref[:, 0:1] + aff_ref[:, 1:2], 0.0)

        # Hoisted border conditions (shared by all taps).
        col = jax.lax.broadcasted_iota(jnp.int32, (1, HW), 1)
        w_idx = jnp.bitwise_and(col, W - 1) if w_pow2 else col % W
        top_ok = col >= W                    # output row h >= 1   (dy = -1)
        bot_ok = col < (H - 1) * W           # output row h <= H-2 (dy = +1)
        lft_ok = w_idx >= 1                  # output col w >= 1   (dx = -1)
        rgt_ok = w_idx < (W - 1)             # output col w <= W-2 (dx = +1)

        acc = jnp.zeros((C_out, HW), jnp.float32)
        k = 0
        for dy in (-1, 0, 1):
            for dx in (-1, 0, 1):
                s = dy * W + dx
                # t[c, p] = src[c, p + dy*W + dx]; the lane wraparound of the
                # flat roll only hits positions the border masks zero out
                # (each block is exactly one image).
                t = src if s == 0 else pltpu.roll(src, shift=(-s) % HW, axis=1)
                conds = []
                if dy == -1:
                    conds.append(top_ok)
                elif dy == 1:
                    conds.append(bot_ok)
                if dx == -1:
                    conds.append(lft_ok)
                elif dx == 1:
                    conds.append(rgt_ok)
                if conds:
                    m = conds[0]
                    for c in conds[1:]:
                        m = jnp.logical_and(m, c)
                    t = jnp.where(m, t, 0.0)
                # TODO(synk): at real channel counts keep the taps bf16-resident
                # (cast src once before the loop) to drop the per-tap VPU cast.
                acc += jnp.dot(w_ref[k], t.astype(mm_dtype),
                               preferred_element_type=jnp.float32)
                k += 1

        # Per-channel batch-stat partials (conv bias omitted: it cancels under
        # batch-statistics BN).  Resident output block -> accumulates across n.
        stats_ref[:, 0:1] += jnp.sum(acc, axis=1, keepdims=True)
        stats_ref[:, 1:2] += jnp.sum(acc * acc, axis=1, keepdims=True)

        y_ref[0] = acc.astype(y_ref.dtype)

    return kernel


def _make_bn_shortcut_kernel(use_1x1conv, mm_dtype):
    """One image per grid step: bn2 affine + shortcut (identity or 1x1 conv
    with bias) + final ReLU."""
    def kernel(*refs):
        if use_1x1conv:
            y_ref, x_ref, aff_ref, w3_ref, b3_ref, out_ref = refs
        else:
            y_ref, x_ref, aff_ref, out_ref = refs
            w3_ref = b3_ref = None

        y = y_ref[0].astype(jnp.float32)
        y = y * aff_ref[:, 0:1] + aff_ref[:, 1:2]            # bn2
        if use_1x1conv:
            sc = jnp.dot(w3_ref[...], x_ref[0].astype(mm_dtype),
                         preferred_element_type=jnp.float32) + b3_ref[...]
        else:
            sc = x_ref[0].astype(jnp.float32)
        out_ref[0] = jnp.maximum(y + sc, 0.0).astype(out_ref.dtype)

    return kernel


# ----------------------------------------------------------------------------
# Wrapper helpers.
# ----------------------------------------------------------------------------
def _pack3x3(w):
    # OIHW (Cout, Cin, 3, 3) -> (9, Cout, Cin), tap-major in (dy, dx) order,
    # matching the in-kernel tap loop.
    return jnp.transpose(w, (2, 3, 0, 1)).reshape(9, w.shape[0], w.shape[1])


def _bn_affine(stats, gamma, beta, count, eps):
    # Fold batch-stat BN into per-channel scale/shift (tiny Cm-vector math).
    mean = stats[:, 0] / count
    var = jnp.maximum(stats[:, 1] / count - mean * mean, 0.0)
    scale = gamma * jax.lax.rsqrt(var + eps)
    shift = beta - mean * scale
    return jnp.stack([scale, shift], axis=1).astype(jnp.float32)   # (Cm, 2)


def _vmem_limit(block_bytes):
    # Double-buffered block working set + headroom, clamped to [16 MiB, 64 MiB]
    # (64 MiB = v7x physical VMEM).
    return int(min(max(2 * block_bytes + (2 << 20), 16 << 20), 64 << 20))


# ----------------------------------------------------------------------------
# Residual block forward (training-mode BatchNorm, stride 1).
# ----------------------------------------------------------------------------
def residual_forward(x_nchw, params, use_1x1conv, *, strides=1,
                     mm_dtype=jnp.float32, interm_dtype=jnp.float32, eps=1e-5):
    # TODO(synk): stride > 1 (downsampling blocks) not supported in-kernel.
    assert strides == 1, "stride > 1 not supported by this Pallas kernel"
    N, Cin, H, W = x_nchw.shape
    Cm = params["w1"].shape[0]
    if not use_1x1conv:
        assert Cin == Cm, "identity shortcut requires Cin == num_channels"
    HW = H * W
    count = float(N * HW)
    isz = jnp.dtype(interm_dtype).itemsize
    wsz = jnp.dtype(mm_dtype).itemsize

    # Free channel-major reshape: per-image blocks are (C, HW) with channels on
    # sublanes and pixels on lanes (HW = 256 here -> lane-dense, 128-aligned).
    x3 = x_nchw.reshape(N, Cin, HW).astype(jnp.float32)

    w1p = _pack3x3(params["w1"]).astype(mm_dtype)       # (9, Cm, Cin)
    w2p = _pack3x3(params["w2"]).astype(mm_dtype)       # (9, Cm, Cm)

    # --- phase 1: conv1 + batch-stat partials -------------------------------
    blk_a = 4 * Cin * HW + wsz * 9 * Cm * Cin + isz * Cm * HW + 4 * Cm * HW + 64
    y1, stats1 = pl.pallas_call(
        _make_conv3x3_stats_kernel(H, W, Cin, Cm, mm_dtype, pre_affine=False),
        grid=(N,),
        in_specs=[
            pl.BlockSpec((1, Cin, HW), lambda n: (n, 0, 0)),
            pl.BlockSpec((9, Cm, Cin), lambda n: (0, 0, 0)),
        ],
        out_specs=(
            pl.BlockSpec((1, Cm, HW), lambda n: (n, 0, 0)),
            pl.BlockSpec((Cm, 2), lambda n: (0, 0)),        # resident accumulator
        ),
        out_shape=(
            jax.ShapeDtypeStruct((N, Cm, HW), interm_dtype),
            jax.ShapeDtypeStruct((Cm, 2), jnp.float32),
        ),
        compiler_params=pltpu.CompilerParams(
            dimension_semantics=("arbitrary",),             # stats accumulate over n
            vmem_limit_bytes=_vmem_limit(blk_a)),
        cost_estimate=pl.CostEstimate(
            flops=int(2 * 9 * Cm * Cin * HW * N), transcendentals=0,
            bytes_accessed=int(4 * N * Cin * HW + wsz * 9 * Cm * Cin
                               + isz * N * Cm * HW)),
    )(x3, w1p)

    aff1 = _bn_affine(stats1, params["g1"], params["be1"], count, eps)

    # --- phase 2: bn1 + relu + conv2 + batch-stat partials -------------------
    blk_b = 2 * isz * Cm * HW + wsz * 9 * Cm * Cm + 4 * Cm * HW + 128
    y2, stats2 = pl.pallas_call(
        _make_conv3x3_stats_kernel(H, W, Cm, Cm, mm_dtype, pre_affine=True),
        grid=(N,),
        in_specs=[
            pl.BlockSpec((1, Cm, HW), lambda n: (n, 0, 0)),
            pl.BlockSpec((9, Cm, Cm), lambda n: (0, 0, 0)),
            pl.BlockSpec((Cm, 2), lambda n: (0, 0)),
        ],
        out_specs=(
            pl.BlockSpec((1, Cm, HW), lambda n: (n, 0, 0)),
            pl.BlockSpec((Cm, 2), lambda n: (0, 0)),
        ),
        out_shape=(
            jax.ShapeDtypeStruct((N, Cm, HW), interm_dtype),
            jax.ShapeDtypeStruct((Cm, 2), jnp.float32),
        ),
        compiler_params=pltpu.CompilerParams(
            dimension_semantics=("arbitrary",),
            vmem_limit_bytes=_vmem_limit(blk_b)),
        cost_estimate=pl.CostEstimate(
            flops=int(2 * 9 * Cm * Cm * HW * N), transcendentals=0,
            bytes_accessed=int(2 * isz * N * Cm * HW + wsz * 9 * Cm * Cm)),
    )(y1, w2p, aff1)

    aff2 = _bn_affine(stats2, params["g2"], params["be2"], count, eps)

    # --- phase 3: bn2 + shortcut + relu --------------------------------------
    inputs = [y2, x3, aff2]
    in_specs = [
        pl.BlockSpec((1, Cm, HW), lambda n: (n, 0, 0)),
        pl.BlockSpec((1, Cin, HW), lambda n: (n, 0, 0)),
        pl.BlockSpec((Cm, 2), lambda n: (0, 0)),
    ]
    if use_1x1conv:
        inputs += [params["w3"].reshape(Cm, Cin).astype(mm_dtype),
                   params["b3"].reshape(Cm, 1).astype(jnp.float32)]
        in_specs += [pl.BlockSpec((Cm, Cin), lambda n: (0, 0)),
                     pl.BlockSpec((Cm, 1), lambda n: (0, 0))]

    blk_c = isz * Cm * HW + 4 * Cin * HW + 4 * Cm * HW + wsz * Cm * Cin + 128
    out3 = pl.pallas_call(
        _make_bn_shortcut_kernel(use_1x1conv, mm_dtype),
        grid=(N,),
        in_specs=in_specs,
        out_specs=pl.BlockSpec((1, Cm, HW), lambda n: (n, 0, 0)),
        out_shape=jax.ShapeDtypeStruct((N, Cm, HW), jnp.float32),
        compiler_params=pltpu.CompilerParams(
            dimension_semantics=("parallel",),              # fully per-image
            vmem_limit_bytes=_vmem_limit(blk_c)),
        cost_estimate=pl.CostEstimate(
            flops=int((2 * Cm * Cin * HW * N) if use_1x1conv else (2 * Cm * HW * N)),
            transcendentals=0,
            bytes_accessed=int(isz * N * Cm * HW + 4 * N * Cin * HW
                               + 4 * N * Cm * HW)),
    )(*inputs)

    return out3.reshape(N, Cm, H, W)                        # free reshape


# ----------------------------------------------------------------------------
# Deterministic synthetic parameters (PyTorch OIHW / BatchNorm2d shapes).
# ----------------------------------------------------------------------------
def init_params(key, Cin, Cm, use_1x1conv):
    ks = jax.random.split(key, 10)
    p = {
        "w1": 0.2 * jax.random.normal(ks[0], (Cm, Cin, 3, 3), jnp.float32),
        "b1": 0.1 * jax.random.normal(ks[1], (Cm,), jnp.float32),
        "w2": 0.2 * jax.random.normal(ks[2], (Cm, Cm, 3, 3), jnp.float32),
        "b2": 0.1 * jax.random.normal(ks[3], (Cm,), jnp.float32),
        "g1": 1.0 + 0.1 * jax.random.normal(ks[4], (Cm,), jnp.float32),
        "be1": 0.1 * jax.random.normal(ks[5], (Cm,), jnp.float32),
        "g2": 1.0 + 0.1 * jax.random.normal(ks[6], (Cm,), jnp.float32),
        "be2": 0.1 * jax.random.normal(ks[7], (Cm,), jnp.float32),
    }
    if use_1x1conv:
        p["w3"] = 0.2 * jax.random.normal(ks[8], (Cm, Cin, 1, 1), jnp.float32)
        p["b3"] = 0.1 * jax.random.normal(ks[9], (Cm,), jnp.float32)
    return p


# ----------------------------------------------------------------------------
# Pure-JAX reference (NCHW, faithful to the PyTorch module incl. conv biases).
# ----------------------------------------------------------------------------
def _ref_residual(x, p, use_1x1conv, eps=1e-5):
    hi = jax.lax.Precision.HIGHEST

    def conv3x3(x, w, b):
        y = jax.lax.conv_general_dilated(
            x, w, window_strides=(1, 1), padding=[(1, 1), (1, 1)],
            dimension_numbers=("NCHW", "OIHW", "NCHW"), precision=hi)
        return y + b.reshape(1, -1, 1, 1)

    def bn(y, g, be):
        m = jnp.mean(y, axis=(0, 2, 3), keepdims=True)
        v = jnp.mean((y - m) ** 2, axis=(0, 2, 3), keepdims=True)
        return (y - m) * jax.lax.rsqrt(v + eps) * g.reshape(1, -1, 1, 1) \
            + be.reshape(1, -1, 1, 1)

    y = jnp.maximum(bn(conv3x3(x, p["w1"], p["b1"]), p["g1"], p["be1"]), 0.0)
    y = bn(conv3x3(y, p["w2"], p["b2"]), p["g2"], p["be2"])
    xr = x
    if use_1x1conv:
        w3 = p["w3"].reshape(p["w3"].shape[0], -1)
        xr = jnp.einsum("oc,nchw->nohw", w3, x, precision=hi) \
            + p["b3"].reshape(1, -1, 1, 1)
    return jnp.maximum(y + xr, 0.0)


if __name__ == "__main__":
    key = jax.random.PRNGKey(0)
    k_x, k_pa, k_pb = jax.random.split(key, 3)

    # Small NCHW input consistent with the module: batch=2, C=4, 16x16 spatial.
    x = jax.random.normal(k_x, (2, 4, 16, 16), jnp.float32)

    configs = [
        (False, 4, k_pa),   # identity shortcut (input_channels == num_channels)
        (True, 8, k_pb),    # 1x1-conv shortcut (channel expansion 4 -> 8)
    ]
    for use_1x1conv, Cm, kp in configs:
        params = init_params(kp, Cin=4, Cm=Cm, use_1x1conv=use_1x1conv)
        ref = _ref_residual(x, params, use_1x1conv)

        # f32 MXU operands (default; accuracy-tight / v5e path).
        out = jax.block_until_ready(residual_forward(x, params, use_1x1conv))
        assert out.shape == (2, Cm, 16, 16), out.shape
        assert jnp.allclose(out, ref, atol=5e-3, rtol=5e-3), (
            "f32 mismatch", float(jnp.max(jnp.abs(out - ref))))

        # bf16 MXU operands (v6e/v7x fast path); f32 accumulation + f32 BN
        # statistics, f32 intermediates.  interm_dtype=bf16 would additionally
        # halve intermediate HBM traffic (v5e) at slightly looser accuracy.
        out_bf = jax.block_until_ready(
            residual_forward(x, params, use_1x1conv, mm_dtype=jnp.bfloat16))
        assert jnp.allclose(out_bf, ref, atol=2e-1, rtol=2e-1), (
            "bf16 mismatch", float(jnp.max(jnp.abs(out_bf - ref))))

    print("KERNEL_OK")
</pallas_src>

<mosaic_0001>
module attributes {stable_mosaic.version = 11 : i64} {
  func.func @kernel(%arg0: i32, %arg1: memref<1x4x256xf32, #tpu.memory_space<vmem>>, %arg2: memref<9x4x4xf32, #tpu.memory_space<vmem>>, %arg3: memref<1x4x256xf32, #tpu.memory_space<vmem>>, %arg4: memref<4x2xf32, #tpu.memory_space<vmem>>) attributes {dimension_semantics = [#tpu.dimension_semantics<arbitrary>], iteration_bounds = array<i64: 2>, scalar_prefetch = 0 : i64, scratch_operands = 0 : i64, tpu.core_type = #tpu.core_type<tc>, window_params = [{transform_indices = @transform_0, window_bounds = array<i64: 1, 4, 256>}, {pipeline_mode = #tpu.pipeline_mode<synchronous>, transform_indices = @transform_1, window_bounds = array<i64: 9, 4, 4>}, {transform_indices = @transform_2, window_bounds = array<i64: 1, 4, 256>}, {pipeline_mode = #tpu.pipeline_mode<synchronous>, transform_indices = @transform_3, window_bounds = array<i64: 4, 2>}]} {
    %c0_i32 = arith.constant 0 : i32
    %0 = arith.cmpi eq, %arg0, %c0_i32 : i32
    %1 = arith.extui %0 : i1 to i32
    %c0_i32_0 = arith.constant 0 : i32
    %2 = arith.cmpi ne, %1, %c0_i32_0 : i32
    scf.if %2 {
      %cst_57 = arith.constant 0.000000e+00 : f32
      %111 = vector.broadcast %cst_57 : f32 to vector<4x2xf32>
      %c0_58 = arith.constant 0 : index
      %c0_59 = arith.constant 0 : index
      %112 = vector.load %arg4[%c0_58, %c0_59] : memref<4x2xf32, #tpu.memory_space<vmem>>, vector<4x2xf32>
      tpu.vector_store %arg4[%c0_58, %c0_59], %111 {strides = array<i32>} : memref<4x2xf32, #tpu.memory_space<vmem>>, vector<4x2xf32>,
    } else {
    }
    %c0 = arith.constant 0 : index
    %c0_1 = arith.constant 0 : index
    %c0_2 = arith.constant 0 : index
    %3 = vector.load %arg1[%c0, %c0_1, %c0_2] : memref<1x4x256xf32, #tpu.memory_space<vmem>>, vector<1x4x256xf32>
    %4 = vector.shape_cast %3 : vector<1x4x256xf32> to vector<4x256xf32>
    %5 = tpu.iota {dimensions = array<i32: 1>} : vector<1x256xi32>
    %c15_i32 = arith.constant 15 : i32
    %6 = vector.broadcast %c15_i32 : i32 to vector<1x256xi32>
    %7 = arith.andi %5, %6 : vector<1x256xi32>
    %c16_i32 = arith.constant 16 : i32
    %8 = vector.broadcast %c16_i32 : i32 to vector<1x256xi32>
    %9 = arith.cmpi sge, %5, %8 : vector<1x256xi32>
    %c240_i32 = arith.constant 240 : i32
    %10 = vector.broadcast %c240_i32 : i32 to vector<1x256xi32>
    %11 = arith.cmpi slt, %5, %10 : vector<1x256xi32>
    %c1_i32 = arith.constant 1 : i32
    %12 = vector.broadcast %c1_i32 : i32 to vector<1x256xi32>
    %13 = arith.cmpi sge, %7, %12 : vector<1x256xi32>
    %c15_i32_3 = arith.constant 15 : i32
    %14 = vector.broadcast %c15_i32_3 : i32 to vector<1x256xi32>
    %15 = arith.cmpi slt, %7, %14 : vector<1x256xi32>
    %cst = arith.constant 0.000000e+00 : f32
    %16 = vector.broadcast %cst : f32 to vector<4x256xf32>
    %c17_i32 = arith.constant 17 : i32
    %17 = tpu.dynamic_rotate %4 by %c17_i32 dim 1 : vector<4x256xf32>, i32 -> vector<4x256xf32>
    %18 = arith.andi %9, %13 : vector<1x256xi1>
    %cst_4 = arith.constant 0.000000e+00 : f32
    %19 = vector.shape_cast %18 : vector<1x256xi1> to vector<1x256xi1>
    %20 = vector.broadcast %19 : vector<1x256xi1> to vector<4x256xi1>
    %21 = vector.broadcast %cst_4 : f32 to vector<4x256xf32>
    %22 = arith.select %20, %17, %21 : vector<4x256xi1>, vector<4x256xf32>
    %c0_5 = arith.constant 0 : index
    %c0_6 = arith.constant 0 : index
    %c0_7 = arith.constant 0 : index
    %23 = vector.load %arg2[%c0_5, %c0_6, %c0_7] : memref<9x4x4xf32, #tpu.memory_space<vmem>>, vector<1x4x4xf32>
    %24 = vector.shape_cast %23 : vector<1x4x4xf32> to vector<4x4xf32>
    %cst_8 = arith.constant dense<0.000000e+00> : vector<4x256xf32>
    %25 = tpu.matmul %24, %22, %cst_8 {dimension_numbers = #tpu.dot_dimension_numbers<[1], [0], [0], [1], [0, 0, 1, 1], [], []>} : vector<4x4xf32>, vector<4x256xf32>, vector<4x256xf32> -> vector<4x256xf32>
    %26 = arith.addf %16, %25 : vector<4x256xf32>
    %c16_i32_9 = arith.constant 16 : i32
    %27 = tpu.dynamic_rotate %4 by %c16_i32_9 dim 1 : vector<4x256xf32>, i32 -> vector<4x256xf32>
    %cst_10 = arith.constant 0.000000e+00 : f32
    %28 = vector.shape_cast %9 : vector<1x256xi1> to vector<1x256xi1>
    %29 = vector.broadcast %28 : vector<1x256xi1> to vector<4x256xi1>
    %30 = vector.broadcast %cst_10 : f32 to vector<4x256xf32>
    %31 = arith.select %29, %27, %30 : vector<4x256xi1>, vector<4x256xf32>
    %c1 = arith.constant 1 : index
    %c0_11 = arith.constant 0 : index
    %c0_12 = arith.constant 0 : index
    %32 = vector.load %arg2[%c1, %c0_11, %c0_12] : memref<9x4x4xf32, #tpu.memory_space<vmem>>, vector<1x4x4xf32>
    %33 = vector.shape_cast %32 : vector<1x4x4xf32> to vector<4x4xf32>
    %cst_13 = arith.constant dense<0.000000e+00> : vector<4x256xf32>
    %34 = tpu.matmul %33, %31, %cst_13 {dimension_numbers = #tpu.dot_dimension_numbers<[1], [0], [0], [1], [0, 0, 1, 1], [], []>} : vector<4x4xf32>, vector<4x256xf32>, vector<4x256xf32> -> vector<4x256xf32>
    %35 = arith.addf %26, %34 : vector<4x256xf32>
    %c15_i32_14 = arith.constant 15 : i32
    %36 = tpu.dynamic_rotate %4 by %c15_i32_14 dim 1 : vector<4x256xf32>, i32 -> vector<4x256xf32>
    %37 = arith.andi %9, %15 : vector<1x256xi1>
    %cst_15 = arith.constant 0.000000e+00 : f32
    %38 = vector.shape_cast %37 : vector<1x256xi1> to vector<1x256xi1>
    %39 = vector.broadcast %38 : vector<1x256xi1> to vector<4x256xi1>
    %40 = vector.broadcast %cst_15 : f32 to vector<4x256xf32>
    %41 = arith.select %39, %36, %40 : vector<4x256xi1>, vector<4x256xf32>
    %c2 = arith.constant 2 : index
    %c0_16 = arith.constant 0 : index
    %c0_17 = arith.constant 0 : index
    %42 = vector.load %arg2[%c2, %c0_16, %c0_17] : memref<9x4x4xf32, #tpu.memory_space<vmem>>, vector<1x4x4xf32>
    %43 = vector.shape_cast %42 : vector<1x4x4xf32> to vector<4x4xf32>
    %cst_18 = arith.constant dense<0.000000e+00> : vector<4x256xf32>
    %44 = tpu.matmul %43, %41, %cst_18 {dimension_numbers = #tpu.dot_dimension_numbers<[1], [0], [0], [1], [0, 0, 1, 1], [], []>} : vector<4x4xf32>, vector<4x256xf32>, vector<4x256xf32> -> vector<4x256xf32>
    %45 = arith.addf %35, %44 : vector<4x256xf32>
    %c1_i32_19 = arith.constant 1 : i32
    %46 = tpu.dynamic_rotate %4 by %c1_i32_19 dim 1 : vector<4x256xf32>, i32 -> vector<4x256xf32>
    %cst_20 = arith.constant 0.000000e+00 : f32
    %47 = vector.shape_cast %13 : vector<1x256xi1> to vector<1x256xi1>
    %48 = vector.broadcast %47 : vector<1x256xi1> to vector<4x256xi1>
    %49 = vector.broadcast %cst_20 : f32 to vector<4x256xf32>
    %50 = arith.select %48, %46, %49 : vector<4x256xi1>, vector<4x256xf32>
    %c3 = arith.constant 3 : index
    %c0_21 = arith.constant 0 : index
    %c0_22 = arith.constant 0 : index
    %51 = vector.load %arg2[%c3, %c0_21, %c0_22] : memref<9x4x4xf32, #tpu.memory_space<vmem>>, vector<1x4x4xf32>
    %52 = vector.shape_cast %51 : vector<1x4x4xf32> to vector<4x4xf32>
    %cst_23 = arith.constant dense<0.000000e+00> : vector<4x256xf32>
    %53 = tpu.matmul %52, %50, %cst_23 {dimension_numbers = #tpu.dot_dimension_numbers<[1], [0], [0], [1], [0, 0, 1, 1], [], []>} : vector<4x4xf32>, vector<4x256xf32>, vector<4x256xf32> -> vector<4x256xf32>
    %54 = arith.addf %45, %53 : vector<4x256xf32>
    %c4 = arith.constant 4 : index
    %c0_24 = arith.constant 0 : index
    %c0_25 = arith.constant 0 : index
    %55 = vector.load %arg2[%c4, %c0_24, %c0_25] : memref<9x4x4xf32, #tpu.memory_space<vmem>>, vector<1x4x4xf32>
    %56 = vector.shape_cast %55 : vector<1x4x4xf32> to vector<4x4xf32>
    %cst_26 = arith.constant dense<0.000000e+00> : vector<4x256xf32>
    %57 = tpu.matmul %56, %4, %cst_26 {dimension_numbers = #tpu.dot_dimension_numbers<[1], [0], [0], [1], [0, 0, 1, 1], [], []>} : vector<4x4xf32>, vector<4x256xf32>, vector<4x256xf32> -> vector<4x256xf32>
    %58 = arith.addf %54, %57 : vector<4x256xf32>
    %c255_i32 = arith.constant 255 : i32
    %59 = tpu.dynamic_rotate %4 by %c255_i32 dim 1 : vector<4x256xf32>, i32 -> vector<4x256xf32>
    %cst_27 = arith.constant 0.000000e+00 : f32
    %60 = vector.shape_cast %15 : vector<1x256xi1> to vector<1x256xi1>
    %61 = vector.broadcast %60 : vector<1x256xi1> to vector<4x256xi1>
    %62 = vector.broadcast %cst_27 : f32 to vector<4x256xf32>
    %63 = arith.select %61, %59, %62 : vector<4x256xi1>, vector<4x256xf32>
    %c5 = arith.constant 5 : index
    %c0_28 = arith.constant 0 : index
    %c0_29 = arith.constant 0 : index
    %64 = vector.load %arg2[%c5, %c0_28, %c0_29] : memref<9x4x4xf32, #tpu.memory_space<vmem>>, vector<1x4x4xf32>
    %65 = vector.shape_cast %64 : vector<1x4x4xf32> to vector<4x4xf32>
    %cst_30 = arith.constant dense<0.000000e+00> : vector<4x256xf32>
    %66 = tpu.matmul %65, %63, %cst_30 {dimension_numbers = #tpu.dot_dimension_numbers<[1], [0], [0], [1], [0, 0, 1, 1], [], []>} : vector<4x4xf32>, vector<4x256xf32>, vector<4x256xf32> -> vector<4x256xf32>
    %67 = arith.addf %58, %66 : vector<4x256xf32>
    %c241_i32 = arith.constant 241 : i32
    %68 = tpu.dynamic_rotate %4 by %c241_i32 dim 1 : vector<4x256xf32>, i32 -> vector<4x256xf32>
    %69 = arith.andi %11, %13 : vector<1x256xi1>
    %cst_31 = arith.constant 0.000000e+00 : f32
    %70 = vector.shape_cast %69 : vector<1x256xi1> to vector<1x256xi1>
    %71 = vector.broadcast %70 : vector<1x256xi1> to vector<4x256xi1>
    %72 = vector.broadcast %cst_31 : f32 to vector<4x256xf32>
    %73 = arith.select %71, %68, %72 : vector<4x256xi1>, vector<4x256xf32>
    %c6 = arith.constant 6 : index
    %c0_32 = arith.constant 0 : index
    %c0_33 = arith.constant 0 : index
    %74 = vector.load %arg2[%c6, %c0_32, %c0_33] : memref<9x4x4xf32, #tpu.memory_space<vmem>>, vector<1x4x4xf32>
    %75 = vector.shape_cast %74 : vector<1x4x4xf32> to vector<4x4xf32>
    %cst_34 = arith.constant dense<0.000000e+00> : vector<4x256xf32>
    %76 = tpu.matmul %75, %73, %cst_34 {dimension_numbers = #tpu.dot_dimension_numbers<[1], [0], [0], [1], [0, 0, 1, 1], [], []>} : vector<4x4xf32>, vector<4x256xf32>, vector<4x256xf32> -> vector<4x256xf32>
    %77 = arith.addf %67, %76 : vector<4x256xf32>
    %c240_i32_35 = arith.constant 240 : i32
    %78 = tpu.dynamic_rotate %4 by %c240_i32_35 dim 1 : vector<4x256xf32>, i32 -> vector<4x256xf32>
    %cst_36 = arith.constant 0.000000e+00 : f32
    %79 = vector.shape_cast %11 : vector<1x256xi1> to vector<1x256xi1>
    %80 = vector.broadcast %79 : vector<1x256xi1> to vector<4x256xi1>
    %81 = vector.broadcast %cst_36 : f32 to vector<4x256xf32>
    %82 = arith.select %80, %78, %81 : vector<4x256xi1>, vector<4x256xf32>
    %c7 = arith.constant 7 : index
    %c0_37 = arith.constant 0 : index
    %c0_38 = arith.constant 0 : index
    %83 = vector.load %arg2[%c7, %c0_37, %c0_38] : memref<9x4x4xf32, #tpu.memory_space<vmem>>, vector<1x4x4xf32>
    %84 = vector.shape_cast %83 : vector<1x4x4xf32> to vector<4x4xf32>
    %cst_39 = arith.constant dense<0.000000e+00> : vector<4x256xf32>
    %85 = tpu.matmul %84, %82, %cst_39 {dimension_numbers = #tpu.dot_dimension_numbers<[1], [0], [0], [1], [0, 0, 1, 1], [], []>} : vector<4x4xf32>, vector<4x256xf32>, vector<4x256xf32> -> vector<4x256xf32>
    %86 = arith.addf %77, %85 : vector<4x256xf32>
    %c239_i32 = arith.constant 239 : i32
    %87 = tpu.dynamic_rotate %4 by %c239_i32 dim 1 : vector<4x256xf32>, i32 -> vector<4x256xf32>
    %88 = arith.andi %11, %15 : vector<1x256xi1>
    %cst_40 = arith.constant 0.000000e+00 : f32
    %89 = vector.shape_cast %88 : vector<1x256xi1> to vector<1x256xi1>
    %90 = vector.broadcast %89 : vector<1x256xi1> to vector<4x256xi1>
    %91 = vector.broadcast %cst_40 : f32 to vector<4x256xf32>
    %92 = arith.select %90, %87, %91 : vector<4x256xi1>, vector<4x256xf32>
    %c8 = arith.constant 8 : index
    %c0_41 = arith.constant 0 : index
    %c0_42 = arith.constant 0 : index
    %93 = vector.load %arg2[%c8, %c0_41, %c0_42] : memref<9x4x4xf32, #tpu.memory_space<vmem>>, vector<1x4x4xf32>
    %94 = vector.shape_cast %93 : vector<1x4x4xf32> to vector<4x4xf32>
    %cst_43 = arith.constant dense<0.000000e+00> : vector<4x256xf32>
    %95 = tpu.matmul %94, %92, %cst_43 {dimension_numbers = #tpu.dot_dimension_numbers<[1], [0], [0], [1], [0, 0, 1, 1], [], []>} : vector<4x4xf32>, vector<4x256xf32>, vector<4x256xf32> -> vector<4x256xf32>
    %96 = arith.addf %86, %95 : vector<4x256xf32>
    %c0_44 = arith.constant 0 : index
    %c0_45 = arith.constant 0 : index
    %97 = vector.load %arg4[%c0_44, %c0_45] : memref<4x2xf32, #tpu.memory_space<vmem>>, vector<4x1xf32>
    %cst_46 = arith.constant dense<0.000000e+00> : vector<4xf32>
    %98 = vector.multi_reduction <add>, %96, %cst_46 [1] : vector<4x256xf32> to vector<4xf32>
    %99 = vector.shape_cast %98 : vector<4xf32> to vector<4x1xf32>
    %100 = arith.addf %97, %99 : vector<4x1xf32>
    %c0_47 = arith.constant 0 : index
    %c0_48 = arith.constant 0 : index
    %101 = vector.load %arg4[%c0_47, %c0_48] : memref<4x2xf32, #tpu.memory_space<vmem>>, vector<4x1xf32>
    tpu.vector_store %arg4[%c0_47, %c0_48], %100 {strides = array<i32>} : memref<4x2xf32, #tpu.memory_space<vmem>>, vector<4x1xf32>,
    %c0_49 = arith.constant 0 : index
    %c1_50 = arith.constant 1 : index
    %102 = vector.load %arg4[%c0_49, %c1_50] : memref<4x2xf32, #tpu.memory_space<vmem>>, vector<4x1xf32>
    %103 = arith.mulf %96, %96 : vector<4x256xf32>
    %cst_51 = arith.constant dense<0.000000e+00> : vector<4xf32>
    %104 = vector.multi_reduction <add>, %103, %cst_51 [1] : vector<4x256xf32> to vector<4xf32>
    %105 = vector.shape_cast %104 : vector<4xf32> to vector<4x1xf32>
    %106 = arith.addf %102, %105 : vector<4x1xf32>
    %c0_52 = arith.constant 0 : index
    %c1_53 = arith.constant 1 : index
    %107 = vector.load %arg4[%c0_52, %c1_53] : memref<4x2xf32, #tpu.memory_space<vmem>>, vector<4x1xf32>
    tpu.vector_store %arg4[%c0_52, %c1_53], %106 {strides = array<i32>} : memref<4x2xf32, #tpu.memory_space<vmem>>, vector<4x1xf32>,
    %c0_54 = arith.constant 0 : index
    %c0_55 = arith.constant 0 : index
    %c0_56 = arith.constant 0 : index
    %108 = vector.load %arg3[%c0_54, %c0_55, %c0_56] : memref<1x4x256xf32, #tpu.memory_space<vmem>>, vector<1x4x256xf32>
    %109 = vector.shape_cast %108 : vector<1x4x256xf32> to vector<4x256xf32>
    %110 = vector.shape_cast %96 : vector<4x256xf32> to vector<1x4x256xf32>
    tpu.vector_store %arg3[%c0_54, %c0_55, %c0_56], %110 {strides = array<i32>} : memref<1x4x256xf32, #tpu.memory_space<vmem>>, vector<1x4x256xf32>,
    return
  }
  func.func @transform_0(%arg0: i32) -> (i32, i32, i32) {
    %c0_i32 = arith.constant 0 : i32
    %c0_i32_0 = arith.constant 0 : i32
    %c0_i32_1 = arith.constant 0 : i32
    return %arg0, %c0_i32, %c0_i32_0 : i32, i32, i32
  }
  func.func @transform_1(%arg0: i32) -> (i32, i32, i32) {
    %c0_i32 = arith.constant 0 : i32
    %c0_i32_0 = arith.constant 0 : i32
    %c0_i32_1 = arith.constant 0 : i32
    %c0_i32_2 = arith.constant 0 : i32
    return %c0_i32, %c0_i32_0, %c0_i32_1 : i32, i32, i32
  }
  func.func @transform_2(%arg0: i32) -> (i32, i32, i32) {
    %c0_i32 = arith.constant 0 : i32
    %c0_i32_0 = arith.constant 0 : i32
    %c0_i32_1 = arith.constant 0 : i32
    return %arg0, %c0_i32, %c0_i32_0 : i32, i32, i32
  }
  func.func @transform_3(%arg0: i32) -> (i32, i32) {
    %c0_i32 = arith.constant 0 : i32
    %c0_i32_0 = arith.constant 0 : i32
    %c0_i32_1 = arith.constant 0 : i32
    return %c0_i32, %c0_i32_0 : i32, i32
  }
}

</mosaic_0001>

<bundles_post_ra>
// kernel: tpu_custom_call.1
= control target key start
LH: loop header
LB: loop body
LE: loop exit
PB: predicated region body
PF: predicated region fallthrough
CT: control target
= control target key end

     0   :  { %9 = vsyncpa [#allocation3], 0  ;;  %s1637_s0 = inlined_call_operand.vmem [shape: f32[2,4,256], index: 0, kind: input, shape index: {}]   ;;  %s1638_s1 = inlined_call_operand.vmem [shape: f32[9,4,4], index: 1, kind: input, shape index: {}]   ;;  %s1639_s2 = inlined_call_operand.hbm [shape: f32[2,4,256], index: 2, kind: output, shape index: {0}]   ;;  %s1640_s3 = inlined_call_operand.vmem [shape: f32[4,2], index: 3, kind: output, shape index: {1}]  }
   0x1   :  { %11 = vsyncpa [#allocation3 + $0x1], 0  ;;  %s1351_s12 = smov 0   ;;  %s1353_s13 = smov 0  }
   0x2   :  { %s1355_s14 = smov 0   ;;  %s1357_s15 = smov 0  }
   0x3 LB: > { %s1372_s16 = sadd.s32 4294967295, %s1318_s15   ;;  %s1158_s17 = sadd.s32 4294967294, %s1318_s15   ;;  %s1318_s15 = sphi %s1357_s15, %s1658_s15   ;;  %s1314_s14 = sphi %s1355_s14, %s1657_s14   ;;  %s1310_s13 = sphi %s1353_s13, %s1656_s13   ;;  %s1306_s12 = sphi %s1351_s12, %s1655_s12  }
   0x4   : > { %s1376_s18 = sadd.s32 1, %s1318_s15   ;;  %s71_s19 = sadd.s32 1, %s1314_s14 }
   0x5   : > { %s68_s20 = ssub.s32 %s1318_s15, %s1376_s18  ;;  %p81_p0 = scmp.ne.s32.totalorder %s1314_s14, %s1310_s13 }
   0x6   : > { %p69_p1 = scmp.eq.s32.totalorder %s68_s20, 0  ;;  %p82_p2 = scmp.eq.s32.totalorder %s1372_s16, 1 }
   0x7   : > { %p87_p3 = scmp.ne.s32.totalorder %s1310_s13, %s1306_s12  ;;  %p88_p4 = scmp.eq.s32.totalorder %s1158_s17, 1 }
   0x8   : > { %s1387_s21 = scalar_select %p69_p1, %s1314_s14, %s71_s19  }
   0x9   : > { %p1389_p5 = por %p82_p2, %p81_p0  ;;  %p1393_p6 = por %p88_p4, %p87_p3 }
   0xa   : > { %p1161_p7 = scmp.ge.s32.totalorder %s1318_s15, 1  ;;  %p138_p8 = scmp.lt.s32.totalorder %s1318_s15, 3 }
   0xc   : > { %p139_p9 = pnand %p1161_p7, %p138_p8 }
   0xd   : > { %s157_s24 = sand.u32 (!%p139_p9), 1, %s1310_s13   ;;  %p162_p10 = scmp.lt.s32.totalorder (!%p139_p9), %s1372_s16, 1 }
   0xe   : > { %142 = sbr.rel (%p139_p9) target bundleno = 526 (0x20e), region = 28  ;;  %s1403_s25 = sshll.u32 (!%p139_p9), %s157_s24, 3 }
   0xf   : > { %s159_s4 = scalar_lea.vmem (!%p139_p9), [#allocation2], %s1403_s25  ;;  %p1165_p11 = scmp.ne.s32.totalorder (!%p139_p9), %s1372_s16, 0 }
  0x13   : > { %s163_s26 = scalar_select %p162_p10, %s1372_s16, 1 }
  0x14   : > { %170 = sbr.rel (%p1165_p11) target bundleno = 27 (0x1b), region = 32 }
  0x15   : > { %s1206_s27 = sshll.u32 %s163_s26, 3 }
  0x16   : > { %s166_s30 = scalar_lea.vmem %s1637_s0, %s1206_s27 }
  0x19   : > { %vm171_vm0 = vcmask 11264   ;;  %v1320_v0 = vmov 0.0  }
  0x1a   : > { %172 = vst.msk [vmem:[%s1640_s3] sm:$0xf] %vm171_vm0, %v1320_v0 }
  0x1b PF: > { %v1414_v1 = vld [vmem:[%s166_s30] sm:$0xff]  ;;  %s1321_s7 = smov 17   ;;  %s1322_s8 = smov 16   ;;  %v1323_v3 = vmov 0.0   ;;  %v174_v4 = vlaneseq  ;;  %vm225_vm5 = vcmask 1043456   ;;  %vm221_vm9 = vcmask 31744  }
  0x1c   : > { %190 = vrot.lane.b32.xlu1 %v1414_v1, %s1321_s7  ;;  %206 = vrot.lane.b32.xlu0 %v1414_v1, %s1322_s8  ;;  %v1420_v2 = vcombine.high %v1414_v1, %v1414_v1  ;;  %s1324_s9 = smov 15   ;;  %s1325_s10 = smov 1   ;;  %v1166_v21 = vld [vmem:[%s1638_s1 + $0x4] sm:$0xf]  ;;  %v205_v25 = vld [vmem:[%s1638_s1] sm:$0xf] }
  0x1d   : > { %296 = vmatprep.mubr.f32.mxu0 %v1323_v3  ;;  %376 = vmatprep.mubr.f32.mxu1 %v1323_v3  ;;  %s1326_s11 = smov 127   ;;  %s1327_s17 = smov 113   ;;  %v1438_v5 = vand.u32 127, %v174_v4  ;;  %v1173_v34 = vld [vmem:[%s1638_s1 + $0x8] sm:$0xf] }
  0x1e   : > { %s1328_s19 = smov 112   ;;  %s1329_s20 = smov 111   ;;  %v1177_v41 = vld [vmem:[%s1638_s1 + $0xc] sm:$0xf]  ;;  %v1181_v42 = vld [vmem:[%s1638_s1 + $0x10] sm:$0xf] }
  0x1f   : > { %v1441_v6 = vadd.s32 128, %v1438_v5  ;;  %v177_v7 = vand.u32 15, %v1438_v5  ;;  %vm179_vm1 = vcmp.ge.s32.totalorder %v1438_v5, 16  ;;  %vm194_vm3 = vcmp.lt.s32.totalorder %v1438_v5, 17  ;;  %v1185_v49 = vld [vmem:[%s1638_s1 + $0x14] sm:$0xf] }
  0x20   : > { %192 = vrot.lane.b32.xlu1 %v1420_v2, %s1321_s7  ;;  %208 = vrot.lane.b32.xlu0 %v1420_v2, %s1322_s8  ;;  %vm210_vm4 = vcmp.lt.s32.totalorder %v1438_v5, 16  ;;  %vm387_vm10 = vcmp.lt.s32.totalorder %v1438_v5, 15  ;;  %vm486_vm13 = vcmp.lt.s32.totalorder %v1438_v5, 1  ;;  %vm665_vm14 = vcmp.lt.s32.totalorder %v1438_v5, 127  ;;  %v1189_v56 = vld [vmem:[%s1638_s1 + $0x18] sm:$0xf] }
  0x21   : > { %v178_v8 = vand.u32 15, %v1441_v6  ;;  %vm1446_vm2 = vcmp.ge.s32.totalorder %v177_v7, 1  ;;  %vm1464_vm8 = vcmp.lt.s32.totalorder %v177_v7, 15  ;;  %vm182_vm15 = vcmp.lt.s32.totalorder %v1441_v6, 240  ;;  %v1193_v61 = vld [vmem:[%s1638_s1 + $0x1c] sm:$0xf] }
  0x22   : > { %vm1460_vm7 = vmand %vm179_vm1, %vm1446_vm2  ;;  %vm762_vm0 = vcmp.lt.s32.totalorder %v1438_v5, 113  ;;  %s1207_s29 = sshll.u32 %s1372_s16, 7  ;;  %s1093_s30 = sshll.u32 %s159_s4, 4  ;;  %s1094_s30 = int_to_ptr.vmem [resolvable:$true] %s1093_s30 }
  0x23   : > { %vm1452_vm6 = vcmp.ge.s32.totalorder %v178_v8, 1  ;;  %vm1484_vm11 = vcmp.lt.s32.totalorder %v178_v8, 15  ;;  %vm1492_vm12 = vmand %vm179_vm1, %vm1464_vm8  ;;  %s1091_s7 = scalar_lea.hbm %s1639_s2, %s1207_s29  ;;  %s1079_s8 = scalar_lea.sflag [#allocation3], %s157_s24 }
  0x24   : > { %385 = vrot.lane.b32.xlu1 %v1420_v2, %s1324_s9  ;;  %383 = vrot.lane.b32.xlu0 %v1414_v1, %s1324_s9  ;;  %s1258_s9 = scalar_lea.vmem %s1094_s30, 128 }
  0x25   : > { %p1259_p12 = scmp.ne.s32.totalorder %s1094_s30, %s1258_s9 }
  0x27   : > { %p1260_p13 = pnand %p1259_p12, %p1389_p5 }
  0x28   : > { %484 = vrot.lane.b32.xlu1 %v1420_v2, %s1325_s10  ;;  %482 = vrot.lane.b32.xlu0 %v1414_v1, %s1325_s10  ;;  %s1330_s10 = smov [#allocation2]  }
  0x29   : > { %p1261_p0 = pneg %p1260_p13 }
  0x2c   : > { %663 = vrot.lane.b32.xlu1 %v1420_v2, %s1326_s11  ;;  %661 = vrot.lane.b32.xlu0 %v1414_v1, %s1326_s11  ;;  %s1262_s11 = sshll.u32 %s1330_s10, 4  ;;  %s1263_s11 = int_to_ptr.vmem [resolvable:$false] %s1262_s11 }
  0x2d   : > { %p1265_p1 = scmp.lt.s32.totalorder %s1094_s30, %s1263_s11 }
  0x30   : > { %760 = vrot.lane.b32.xlu1 %v1420_v2, %s1327_s17  ;;  %758 = vrot.lane.b32.xlu0 %v1414_v1, %s1327_s17  ;;  %s1264_s17 = scalar_lea.vmem %s1263_s11, 256 }
  0x31   : > { %p1266_p2 = scmp.lt.s32.totalorder %s1264_s17, %s1258_s9 }
  0x33   : > { %p1267_p3 = por %p1266_p2, %p1265_p1 }
  0x34   : > { %859 = vrot.lane.b32.xlu1 %v1420_v2, %s1328_s19  ;;  %857 = vrot.lane.b32.xlu0 %v1414_v1, %s1328_s19 }
  0x35   : > { %p1268_p4 = pnand %p1267_p3, %p1261_p0 }
  0x38   : > { %956 = vrot.lane.b32.xlu1 %v1420_v2, %s1329_s20  ;;  %954 = vrot.lane.b32.xlu0 %v1414_v1, %s1329_s20 }
  0x8e   : > { %v191_v9 = vpop.permute.xlu1 %190  ;;  %v207_v10 = vpop.permute.xlu0 %206 }
  0x92   : > { %v193_v14 = vpop.permute.xlu1 %192  ;;  %v209_v15 = vpop.permute.xlu0 %208 }
  0x93   : > { %v196_v17 = vsel %vm194_vm3, %v193_v14, %v191_v9  ;;  %v212_v18 = vsel %vm210_vm4, %v209_v15, %v207_v10  ;;  %v211_v19 = vsel %vm210_vm4, %v207_v10, %v209_v15  ;;  %v195_v20 = vsel %vm194_vm3, %v191_v9, %v193_v14  ;;  %vm962_vm4 = vmand %vm182_vm15, %vm1484_vm11 }
  0x94   : > { %1167 = vmatprep.subr.msk.mxu0 %vm225_vm5, %v211_v19  ;;  %v217_v22 = vsel %vm179_vm1, %v212_v18, 0.0  ;;  %v204_v23 = vsel %vm1452_vm6, %v195_v20, 0.0  ;;  %v203_v24 = vsel %vm1460_vm7, %v196_v17, 0.0  ;;  %vm766_vm1 = vmand %vm182_vm15, %vm1452_vm6  ;;  %vm861_vm3 = vcmp.lt.s32.totalorder %v1438_v5, 112 }
  0x95   : > { %1168 = vmatpush1.msk.msra.mxu0 %vm225_vm5, %v217_v22  ;;  %1170 = vmatprep.subr.msk.mxu1 %vm225_vm5, %v204_v23 }
  0x96   : > { %1171 = vmatpush1.msk.msra.mxu1 %vm225_vm5, %v203_v24  ;;  %v386_v28 = vpop.permute.xlu1 %385  ;;  %v384_v29 = vpop.permute.xlu0 %383  ;;  %1169 = vmatmul.mubr.msk.f32.vlgmr.msra.gmra.mxu0 %vm221_vm9, %v1166_v21 }
  0x97   : > { %v388_v30 = vsel %vm387_vm10, %v384_v29, %v386_v28  ;;  %v389_v31 = vsel %vm387_vm10, %v386_v28, %v384_v29  ;;  %1172 = vmatmul.mubr.msk.f32.vlgmr.msra.gmra.mxu1 %vm221_vm9, %v205_v25  ;;  %473 = vmatprep.mubr.f32.mxu0 %v1323_v3 }
  0x98   : > { %v396_v32 = vsel %vm1492_vm12, %v389_v31, 0.0  ;;  %v397_v33 = vsel %vm1484_vm11, %v388_v30, 0.0  ;;  %570 = vmatprep.mubr.f32.mxu1 %v1323_v3 }
  0x99   : > { %1174 = vmatprep.subr.msk.mxu0 %vm225_vm5, %v397_v33 }
  0x9a   : > { %v485_v35 = vpop.permute.xlu1 %484  ;;  %1175 = vmatpush1.msk.msra.mxu0 %vm225_vm5, %v396_v32  ;;  %v483_v36 = vpop.permute.xlu0 %482 }
  0x9b   : > { %v487_v37 = vsel %vm486_vm13, %v483_v36, %v485_v35  ;;  %v488_v38 = vsel %vm486_vm13, %v485_v35, %v483_v36  ;;  %1176 = vmatmul.mubr.msk.f32.vlgmr.msra.gmra.mxu0 %vm221_vm9, %v1173_v34  ;;  %1182 = vmatprep.subr.msk.mxu0 %vm225_vm5, %v1420_v2 }
  0x9c   : > { %v493_v39 = vsel %vm1446_vm2, %v488_v38, 0.0  ;;  %v494_v40 = vsel %vm1452_vm6, %v487_v37, 0.0  ;;  %1183 = vmatpush1.msk.msra.mxu0 %vm225_vm5, %v1414_v1  ;;  %652 = vmatprep.mubr.f32.mxu0 %v1323_v3 }
  0x9d   : > { %1178 = vmatprep.subr.msk.mxu1 %vm225_vm5, %v494_v40 }
  0x9e   : > { %v664_v43 = vpop.permute.xlu1 %663  ;;  %1179 = vmatpush1.msk.msra.mxu1 %vm225_vm5, %v493_v39  ;;  %v662_v44 = vpop.permute.xlu0 %661 }
  0x9f   : > { %v666_v45 = vsel %vm665_vm14, %v662_v44, %v664_v43  ;;  %v667_v46 = vsel %vm665_vm14, %v664_v43, %v662_v44  ;;  %1180 = vmatmul.mubr.msk.f32.vlgmr.msra.gmra.mxu1 %vm221_vm9, %v1177_v41  ;;  %1184 = vmatmul.mubr.msk.f32.vlgmr.msra.gmra.mxu0 %vm221_vm9, %v1181_v42 }
  0xa0   : > { %v672_v47 = vsel %vm1464_vm8, %v666_v45, 0.0  ;;  %v673_v48 = vsel %vm1484_vm11, %v667_v46, 0.0  ;;  %749 = vmatprep.mubr.f32.mxu1 %v1323_v3  ;;  %848 = vmatprep.mubr.f32.mxu0 %v1323_v3 }
  0xa1   : > { %1186 = vmatprep.subr.msk.mxu1 %vm225_vm5, %v673_v48 }
  0xa2   : > { %v761_v50 = vpop.permute.xlu1 %760  ;;  %1187 = vmatpush1.msk.msra.mxu1 %vm225_vm5, %v672_v47  ;;  %v759_v51 = vpop.permute.xlu0 %758 }
  0xa3   : > { %v763_v52 = vsel %vm762_vm0, %v759_v51, %v761_v50  ;;  %v764_v53 = vsel %vm762_vm0, %v761_v50, %v759_v51  ;;  %1188 = vmatmul.mubr.msk.f32.vlgmr.msra.gmra.mxu1 %vm221_vm9, %v1185_v49 }
  0xa4   : > { %v771_v54 = vsel %vm1446_vm2, %v763_v52, 0.0  ;;  %v772_v55 = vsel %vm766_vm1, %v764_v53, 0.0  ;;  %945 = vmatprep.mubr.f32.mxu1 %v1323_v3  ;;  %vm958_vm2 = vcmp.lt.s32.totalorder %v1438_v5, 111  ;;  %v1197_v5 = vld [vmem:[%s1638_s1 + $0x20] sm:$0xf] }
  0xa5   : > { %1190 = vmatprep.subr.msk.mxu0 %vm225_vm5, %v772_v55 }
  0xa6   : > { %v860_v57 = vpop.permute.xlu1 %859  ;;  %1191 = vmatpush1.msk.msra.mxu0 %vm225_vm5, %v771_v54  ;;  %v858_v58 = vpop.permute.xlu0 %857 }
  0xa7   : > { %v863_v59 = vsel %vm861_vm3, %v860_v57, %v858_v58  ;;  %1192 = vmatmul.mubr.msk.f32.vlgmr.msra.gmra.mxu0 %vm221_vm9, %v1189_v56  ;;  %v862_v62 = vsel %vm861_vm3, %v858_v58, %v860_v57 }
  0xa8   : > { %v869_v60 = vsel %vm182_vm15, %v863_v59, 0.0  ;;  %1044 = vmatprep.mubr.f32.mxu0 %v1323_v3 }
  0xa9   : > { %1194 = vmatprep.subr.msk.mxu1 %vm225_vm5, %v869_v60 }
  0xaa   : > { %v957_v63 = vpop.permute.xlu1 %956  ;;  %1195 = vmatpush1.msk.msra.mxu1 %vm225_vm5, %v862_v62  ;;  %v955_v0 = vpop.permute.xlu0 %954 }
  0xab   : > { %v959_v1 = vsel %vm958_vm2, %v955_v0, %v957_v63  ;;  %v960_v2 = vsel %vm958_vm2, %v957_v63, %v955_v0  ;;  %1196 = vmatmul.mubr.msk.f32.vlgmr.msra.gmra.mxu1 %vm221_vm9, %v1193_v61 }
  0xac   : > { %v967_v4 = vsel %vm1464_vm8, %v959_v1, 0.0  ;;  %v968_v3 = vsel %vm962_vm4, %v960_v2, 0.0 }
  0xad   : > { %1198 = vmatprep.subr.msk.mxu0 %vm225_vm5, %v968_v3 }
  0xae   : > { %1199 = vmatpush1.msk.msra.mxu0 %vm225_vm5, %v967_v4 }
  0xaf   : > { %1200 = vmatmul.mubr.msk.f32.vlgmr.msra.gmra.mxu0 %vm221_vm9, %v1197_v5 }
 0x156   : > { %v298_v6 = vpop.f32.mrf.mxu0 }
 0x157   : > { %v378_v7 = vpop.f32.mrf.mxu1 }
 0x158   : > { %v300_v8 = vpop.f32.mrf.mxu0  ;;  %v379_v9 = vadd.f32 %v378_v7, %v298_v6 }
 0x159   : > { %v380_v10 = vpop.f32.mrf.mxu1 }
 0x15a   : > { %v381_v11 = vadd.f32 %v380_v10, %v300_v8 }
 0x15b   : > { %v475_v12 = vpop.f32.mrf.mxu0 }
 0x15c   : > { %v480_v13 = vadd.f32 %v475_v12, %v379_v9 }
 0x15d   : > { %v477_v14 = vpop.f32.mrf.mxu0 }
 0x15e   : > { %v481_v15 = vadd.f32 %v477_v14, %v381_v11 }
 0x15f   : > { %v572_v16 = vpop.f32.mrf.mxu1  ;;  %v654_v17 = vpop.f32.mrf.mxu0 }
 0x160   : > { %v577_v18 = vadd.f32 %v572_v16, %v480_v13 }
 0x161   : > { %v574_v19 = vpop.f32.mrf.mxu1  ;;  %v656_v22 = vpop.f32.mrf.mxu0 }
 0x162   : > { %v578_v20 = vadd.f32 %v574_v19, %v481_v15  ;;  %v659_v21 = vadd.f32 %v654_v17, %v577_v18 }
 0x163   : > { %v751_v23 = vpop.f32.mrf.mxu1 }
 0x164   : > { %v660_v24 = vadd.f32 %v656_v22, %v578_v20  ;;  %v756_v25 = vadd.f32 %v751_v23, %v659_v21 }
 0x165   : > { %v753_v26 = vpop.f32.mrf.mxu1 }
 0x166   : > { %v757_v28 = vadd.f32 %v753_v26, %v660_v24 }
 0x167   : > { %v850_v27 = vpop.f32.mrf.mxu0 }
 0x168   : > { %v855_v29 = vadd.f32 %v850_v27, %v756_v25 }
 0x169   : > { %v852_v30 = vpop.f32.mrf.mxu0 }
 0x16a   : > { %v856_v33 = vadd.f32 %v852_v30, %v757_v28 }
 0x16b   : > { %v947_v31 = vpop.f32.mrf.mxu1 }
 0x16c   : > { %v952_v34 = vadd.f32 %v947_v31, %v855_v29 }
 0x16d   : > { %v949_v32 = vpop.f32.mrf.mxu1 }
 0x16e   : > { %v953_v36 = vadd.f32 %v949_v32, %v856_v33 }
 0x16f   : > { %v1046_v35 = vpop.f32.mrf.mxu0 }
 0x170   : > { %v1051_v37 = vadd.f32 %v1046_v35, %v952_v34 }
 0x171   : > { %v1048_v38 = vpop.f32.mrf.mxu0 }
 0x172   : > { %v1052_v39 = vadd.f32 %v1048_v38, %v953_v36  ;;  %v1063_v40 = vmul.f32 %v1051_v37, %v1051_v37  ;;  %v1054_v41 = vsel %vm225_vm5, %v1051_v37, 0.0 }
 0x174   : > { %v1055_v42 = vsel %vm225_vm5, %v1052_v39, 0.0  ;;  %v1064_v43 = vmul.f32 %v1052_v39, %v1052_v39  ;;  %v1075_v44 = vcombine.low %v1051_v37, %v1052_v39  ;;  %v1065_v46 = vsel %vm225_vm5, %v1063_v40, 0.0 }
 0x175   : > { %v1056_v45 = vadd.f32 %v1055_v42, %v1054_v41 }
 0x176   : > { %v1066_v47 = vsel %vm225_vm5, %v1064_v43, 0.0  ;;  %1077 = vst [vmem:[%s159_s4] sm:$0xff] %v1075_v44 }
 0x177   : > { %1057 = vadd.xlane.f32.xlu0 %v1056_v45  ;;  %v1067_v48 = vadd.f32 %v1066_v47, %v1065_v46 }
 0x179   : > { %1068 = vadd.xlane.f32.xlu1 %v1067_v48 }
 0x17a   : > { %1271 = shalt.err (!%p1268_p4)
}
 0x17b   : > { %s1272_s16 = scalar_lea.hbm %s1091_s7, 128  ;;  %s1276_s4 = scalar_lea.hbm %s1639_s2, 256 }
 0x17c   : > { %p1273_p7 = scmp.ne.s32.totalorder %s1091_s7, %s1272_s16  ;;  %p1277_p10 = scmp.lt.s32.totalorder %s1091_s7, %s1639_s2 }
 0x17d   : > { %p1278_p11 = scmp.lt.s32.totalorder %s1276_s4, %s1272_s16 }
 0x17e   : > { %p1274_p8 = pnand %p1273_p7, %p1389_p5 }
 0x17f   : > { %p1279_p12 = por %p1278_p11, %p1277_p10 }
 0x180   : > { %p1275_p9 = pneg %p1274_p8 }
 0x182   : > { %p1280_p13 = pnand %p1279_p12, %p1275_p9 }
 0x184   : > { %1283 = shalt.err (!%p1280_p13)
}
 0x185   : > { %1208 = dma.vmem_to_hbm [thread:$0]  (%p1389_p5), %s1094_s30, 128, %s1091_s7, %s1079_s8   ;;  %v1053_v49 = vld [vmem:[%s1640_s3] sm:$0xf]  ;;  %vm1060_vm5 = vcmask 3072   ;;  %vm1071_vm6 = vcmask 11272  }
 0x200   : > { %v1058_v50 = vpop.xlane.xlu0 %1057 }
 0x201   : > { %v1059_v51 = vadd.f32 %v1058_v50, %v1053_v49 }
 0x202   : > { %v1069_v52 = vpop.xlane.xlu1 %1068 }
 0x203   : > { %1061 = vst.msk [vmem:[%s1640_s3] sm:$0xf] %vm1060_vm5, %v1059_v51 }
 0x20a   : > { %v1062_v53 = vld [vmem:[%s1640_s3] sm:$0xf] }
 0x20b   : > { %v1070_v54 = vadd.f32 %v1069_v52, %v1062_v53 }
 0x20d   : > { %1072 = vst.msk [vmem:[%s1640_s3] sm:$0xf] %vm1071_vm6, %v1070_v54 }
 0x20e PF: > { %p1214_p5 = scmp.ge.s32.totalorder %s1318_s15, 2  ;;  %s1111_s7 = sand.u32 1, %s1306_s12  }
 0x20f   : > { %s1112_s8 = scalar_lea.sflag [#allocation3], %s1111_s7 }
 0x210   : > { %p1211_p0 = pnand %p1214_p5, %p1393_p6 }
 0x212   : > { %p1212_p1 = pneg %p1211_p0 }
 0x214   : > { %1301 = dma.done.wait (%p1212_p1), %s1112_s8, 128  }
 0x215   : > { %1303 = vsyncadd (%p1212_p1), %s1112_s8, 4294967168  ;;  %p14_p2 = scmp.ge.s32.totalorder %s1376_s18, 4   ;;  %s1655_s12 = smov %s1310_s13 }
 0x216   : > { %s1656_s13 = smov %s1314_s14  ;;  %s1657_s14 = smov %s1387_s21 }
 0x217   : > { %s1658_s15 = smov %s1376_s18  ;;  %16 = sbr.rel (!%p14_p2) target bundleno = 3 (0x3), region = 83 }
 0x21c   :  { %1117 = vsyncpa [#allocation3], 1 }
 0x21d   :  { %1119 = vsyncpa [#allocation3 + $0x1], 1 }

</bundles_post_ra>
